<compile_context>
chip_gen: v6e
topology: v6e:2x2x1
jax: 0.10.0
libtpu: 0.0.40
codegen_flags: <defaults>
</compile_context>

<pallas_src>
import jax
import jax.numpy as jnp
from jax.experimental import pallas as pl
from jax.experimental.pallas import tpu as pltpu


# ---------------------------------------------------------------------------
# Kernels
# ---------------------------------------------------------------------------

def lstm_cell_kernel(x_ref, h_ref, c_ref, wx_ref, wh_ref, b_ref,
                     h_out_ref, c_out_ref):
    """One LSTM step. Gate columns packed as [f, i, o, c]."""
    wdt = wx_ref.dtype
    gates = (jnp.dot(x_ref[...].astype(wdt), wx_ref[...],
                     preferred_element_type=jnp.float32)
             + jnp.dot(h_ref[...].astype(wdt), wh_ref[...],
                       preferred_element_type=jnp.float32)
             + b_ref[...])

    H = c_ref.shape[1]
    sig = jax.nn.sigmoid(gates[:, :3 * H])      # f, i, o in one EUP pass
    f_t = sig[:, 0 * H:1 * H]
    i_t = sig[:, 1 * H:2 * H]
    o_t = sig[:, 2 * H:3 * H]
    c_tilde = jnp.tanh(gates[:, 3 * H:])

    c_t = f_t * c_ref[...] + i_t * c_tilde
    h_t = o_t * jnp.tanh(c_t)

    h_out_ref[...] = h_t
    c_out_ref[...] = c_t


def lstm_seq_kernel(x_ref, h0_ref, c0_ref, wx_ref, wh_ref, b_ref,
                    h_seq_ref, c_out_ref, h_scr, c_scr):
    """T LSTM steps; grid axis 0 = time. Weights resident, state in scratch."""
    t = pl.program_id(0)

    @pl.when(t == 0)
    def _():
        h_scr[...] = h0_ref[...]
        c_scr[...] = c0_ref[...]

    wdt = wx_ref.dtype
    x_t = x_ref[0]                               # (B, I), bf16
    gates = (jnp.dot(x_t.astype(wdt), wx_ref[...],
                     preferred_element_type=jnp.float32)
             + jnp.dot(h_scr[...].astype(wdt), wh_ref[...],
                       preferred_element_type=jnp.float32)
             + b_ref[...])

    H = c_scr.shape[1]
    sig = jax.nn.sigmoid(gates[:, :3 * H])
    f_t = sig[:, 0 * H:1 * H]
    i_t = sig[:, 1 * H:2 * H]
    o_t = sig[:, 2 * H:3 * H]
    c_tilde = jnp.tanh(gates[:, 3 * H:])

    c_t = f_t * c_scr[...] + i_t * c_tilde
    h_t = o_t * jnp.tanh(c_t)

    h_scr[...] = h_t
    c_scr[...] = c_t
    h_seq_ref[0] = h_t                           # per-step output (lane-dense H)
    c_out_ref[...] = c_t                         # constant block -> written back at end


# ---------------------------------------------------------------------------
# Wrappers
# ---------------------------------------------------------------------------

def lstm_cell(x_t, h_prev, c_prev, w_x, w_h, b):
    """Single step (the nn.Module forward).  x:(B,I), h/c:(B,H) f32,
    w_x:(I,4H) / w_h:(H,4H) bf16, b:(1,4H) f32."""
    B, I = x_t.shape
    H = h_prev.shape[1]
    G = 4 * H
    full = lambda shape: pl.BlockSpec(shape, lambda: (0,) * len(shape))

    return pl.pallas_call(
        lstm_cell_kernel,
        out_shape=(
            jax.ShapeDtypeStruct((B, H), jnp.float32),
            jax.ShapeDtypeStruct((B, H), jnp.float32),
        ),
        grid=(),
        in_specs=[
            full((B, I)),   # x_t
            full((B, H)),   # h_prev
            full((B, H)),   # c_prev
            full((I, G)),   # W_x (fused gates, x rows)
            full((H, G)),   # W_h (fused gates, h rows)
            full((1, G)),   # fused bias
        ],
        out_specs=(full((B, H)), full((B, H))),
        # Reuse the previous-state HBM buffers for the new state
        # (caller must donate h_prev/c_prev at the jit boundary).
        input_output_aliases={1: 0, 2: 1},
    )(x_t, h_prev, c_prev, w_x, w_h, b)


def lstm_sequence(x_seq, h0, c0, w_x, w_h, b):
    """T steps of the cell in one kernel.  x_seq:(T,B,I) bf16, h0/c0:(B,H) f32.
    Returns (h_seq:(T,B,H) f32, c_T:(B,H) f32)."""
    T, B, I = x_seq.shape
    H = h0.shape[1]
    G = 4 * H

    return pl.pallas_call(
        lstm_seq_kernel,
        out_shape=(
            jax.ShapeDtypeStruct((T, B, H), jnp.float32),
            jax.ShapeDtypeStruct((B, H), jnp.float32),
        ),
        grid_spec=pltpu.PrefetchScalarGridSpec(
            num_scalar_prefetch=0,
            grid=(T,),
            in_specs=[
                pl.BlockSpec((1, B, I), lambda t: (t, 0, 0)),   # x streamed per step
                pl.BlockSpec((B, H), lambda t: (0, 0)),          # h0 (read at t==0)
                pl.BlockSpec((B, H), lambda t: (0, 0)),          # c0 (read at t==0)
                pl.BlockSpec((I, G), lambda t: (0, 0)),          # W_x resident
                pl.BlockSpec((H, G), lambda t: (0, 0)),          # W_h resident
                pl.BlockSpec((1, G), lambda t: (0, 0)),          # bias resident
            ],
            out_specs=(
                pl.BlockSpec((1, B, H), lambda t: (t, 0, 0)),    # h_t per step
                pl.BlockSpec((B, H), lambda t: (0, 0)),          # final c
            ),
            scratch_shapes=[
                pltpu.VMEM((B, H), jnp.float32),                 # h state
                pltpu.VMEM((B, H), jnp.float32),                 # c state
            ],
        ),
        compiler_params=pltpu.CompilerParams(
            dimension_semantics=("arbitrary",)),
    )(x_seq, h0, c0, w_x, w_h, b)


# ---------------------------------------------------------------------------
# Params & pure-JAX reference (mirror of the torch module)
# ---------------------------------------------------------------------------

def init_params(key, input_size, hidden_size):
    """Per-gate params matching nn.Linear's default U(-1/sqrt(fan_in), ...).
    torch stores weight (H, D); we keep (D, H) so combined @ W == combined @ w.T."""
    D = input_size + hidden_size
    bound = 1.0 / jnp.sqrt(jnp.float32(D))
    keys = jax.random.split(key, 8)
    params = {}
    for idx, gate in enumerate(["f", "i", "c", "o"]):
        params[f"W_{gate}"] = jax.random.uniform(
            keys[2 * idx], (D, hidden_size), jnp.float32, -bound, bound)
        params[f"b_{gate}"] = jax.random.uniform(
            keys[2 * idx + 1], (1, hidden_size), jnp.float32, -bound, bound)
    return params


def pack_params(params, input_size, weight_dtype=jnp.bfloat16):
    """Fuse gates in [f, i, o, c] order and split the reduction dim into
    W_x (I,4H) / W_h (H,4H).  Weights bf16 (HBM/MXU format), bias f32."""
    order = ["f", "i", "o", "c"]
    w_full = jnp.concatenate([params[f"W_{g}"] for g in order], axis=1)
    b_full = jnp.concatenate([params[f"b_{g}"] for g in order], axis=1)
    w_x = w_full[:input_size].astype(weight_dtype)
    w_h = w_full[input_size:].astype(weight_dtype)
    return w_x, w_h, b_full.astype(jnp.float32)


def reference_lstm_cell(x_t, h_prev, c_prev, params):
    combined = jnp.concatenate([x_t, h_prev], axis=1)
    f_t = jax.nn.sigmoid(combined @ params["W_f"] + params["b_f"])
    i_t = jax.nn.sigmoid(combined @ params["W_i"] + params["b_i"])
    c_tilde = jnp.tanh(combined @ params["W_c"] + params["b_c"])
    c_t = f_t * c_prev + i_t * c_tilde
    o_t = jax.nn.sigmoid(combined @ params["W_o"] + params["b_o"])
    h_t = o_t * jnp.tanh(c_t)
    return h_t, c_t


def reference_lstm_sequence(x_seq, h0, c0, params):
    h, c = h0, c0
    hs = []
    for t in range(x_seq.shape[0]):
        h, c = reference_lstm_cell(x_seq[t], h, c, params)
        hs.append(h)
    return jnp.stack(hs, axis=0), c


# ---------------------------------------------------------------------------
# Driver
# ---------------------------------------------------------------------------

if __name__ == "__main__":
    # Shapes from the original module: input_size=300, hidden_size=128.
    batch = 8
    input_size = 300
    hidden_size = 128
    seq_len = 8

    key = jax.random.PRNGKey(0)
    k_x, k_h, k_c, k_p = jax.random.split(key, 4)
    x_seq = jax.random.normal(k_x, (seq_len, batch, input_size), jnp.float32)
    h0 = jax.random.normal(k_h, (batch, hidden_size), jnp.float32)
    c0 = jax.random.normal(k_c, (batch, hidden_size), jnp.float32)

    params = init_params(k_p, input_size, hidden_size)
    w_x, w_h, b = pack_params(params, input_size)
    x_seq_bf16 = x_seq.astype(jnp.bfloat16)

    # f32 references computed BEFORE any donated call uses h0/c0.
    h_seq_ref, c_last_ref = reference_lstm_sequence(x_seq, h0, c0, params)
    h1_ref, c1_ref = reference_lstm_cell(x_seq[0], h0, c0, params)

    # Sequence kernel: time loop internalized, weights VMEM-resident.
    h_seq, c_last = jax.jit(lstm_sequence)(x_seq_bf16, h0, c0, w_x, w_h, b)
    jax.block_until_ready((h_seq, c_last))
    assert jnp.allclose(h_seq, h_seq_ref, atol=5e-2, rtol=5e-2), "h_seq mismatch"
    assert jnp.allclose(c_last, c_last_ref, atol=5e-2, rtol=5e-2), "c_T mismatch"

    # Single-step kernel (the module's forward); donate state buffers so the
    # in-kernel input_output_aliases actually reuse the h/c HBM buffers.
    step = jax.jit(lstm_cell, donate_argnums=(1, 2))
    h1, c1 = step(x_seq_bf16[0], h0, c0, w_x, w_h, b)
    jax.block_until_ready((h1, c1))
    assert jnp.allclose(h1, h1_ref, atol=5e-2, rtol=5e-2), "h_t mismatch"
    assert jnp.allclose(c1, c1_ref, atol=5e-2, rtol=5e-2), "c_t mismatch"

    print("KERNEL_OK")
</pallas_src>

<mosaic_0001>
module attributes {stable_mosaic.version = 11 : i64} {
  func.func @lstm_seq_kernel(%arg0: i32, %arg1: memref<1x8x300xbf16, #tpu.memory_space<vmem>>, %arg2: memref<8x128xf32, #tpu.memory_space<vmem>>, %arg3: memref<8x128xf32, #tpu.memory_space<vmem>>, %arg4: memref<300x512xbf16, #tpu.memory_space<vmem>>, %arg5: memref<128x512xbf16, #tpu.memory_space<vmem>>, %arg6: memref<1x512xf32, #tpu.memory_space<vmem>>, %arg7: memref<1x8x128xf32, #tpu.memory_space<vmem>>, %arg8: memref<8x128xf32, #tpu.memory_space<vmem>>, %arg9: memref<8x128xf32, #tpu.memory_space<vmem>>, %arg10: memref<8x128xf32, #tpu.memory_space<vmem>>) attributes {dimension_semantics = [#tpu.dimension_semantics<arbitrary>], iteration_bounds = array<i64: 8>, scalar_prefetch = 0 : i64, scratch_operands = 2 : i64, tpu.core_type = #tpu.core_type<tc>, window_params = [{transform_indices = @transform_0, window_bounds = array<i64: 1, 8, 300>}, {pipeline_mode = #tpu.pipeline_mode<synchronous>, transform_indices = @transform_1, window_bounds = array<i64: 8, 128>}, {pipeline_mode = #tpu.pipeline_mode<synchronous>, transform_indices = @transform_2, window_bounds = array<i64: 8, 128>}, {pipeline_mode = #tpu.pipeline_mode<synchronous>, transform_indices = @transform_3, window_bounds = array<i64: 300, 512>}, {pipeline_mode = #tpu.pipeline_mode<synchronous>, transform_indices = @transform_4, window_bounds = array<i64: 128, 512>}, {pipeline_mode = #tpu.pipeline_mode<synchronous>, transform_indices = @transform_5, window_bounds = array<i64: 1, 512>}, {transform_indices = @transform_6, window_bounds = array<i64: 1, 8, 128>}, {pipeline_mode = #tpu.pipeline_mode<synchronous>, transform_indices = @transform_7, window_bounds = array<i64: 8, 128>}]} {
    %c0_i32 = arith.constant 0 : i32
    %0 = arith.cmpi eq, %arg0, %c0_i32 : i32
    %1 = arith.extui %0 : i1 to i32
    %c0_i32_0 = arith.constant 0 : i32
    %2 = arith.cmpi ne, %1, %c0_i32_0 : i32
    scf.if %2 {
      %c0_24 = arith.constant 0 : index
      %c0_25 = arith.constant 0 : index
      %38 = vector.load %arg2[%c0_24, %c0_25] : memref<8x128xf32, #tpu.memory_space<vmem>>, vector<8x128xf32>
      %c0_26 = arith.constant 0 : index
      %c0_27 = arith.constant 0 : index
      %39 = vector.load %arg9[%c0_26, %c0_27] : memref<8x128xf32, #tpu.memory_space<vmem>>, vector<8x128xf32>
      tpu.vector_store %arg9[%c0_26, %c0_27], %38 {strides = array<i32>} : memref<8x128xf32, #tpu.memory_space<vmem>>, vector<8x128xf32>,
      %c0_28 = arith.constant 0 : index
      %c0_29 = arith.constant 0 : index
      %40 = vector.load %arg3[%c0_28, %c0_29] : memref<8x128xf32, #tpu.memory_space<vmem>>, vector<8x128xf32>
      %c0_30 = arith.constant 0 : index
      %c0_31 = arith.constant 0 : index
      %41 = vector.load %arg10[%c0_30, %c0_31] : memref<8x128xf32, #tpu.memory_space<vmem>>, vector<8x128xf32>
      tpu.vector_store %arg10[%c0_30, %c0_31], %40 {strides = array<i32>} : memref<8x128xf32, #tpu.memory_space<vmem>>, vector<8x128xf32>,
    } else {
    }
    %c0 = arith.constant 0 : index
    %c0_1 = arith.constant 0 : index
    %c0_2 = arith.constant 0 : index
    %3 = vector.load %arg1[%c0, %c0_1, %c0_2] : memref<1x8x300xbf16, #tpu.memory_space<vmem>>, vector<1x8x300xbf16>
    %4 = vector.shape_cast %3 : vector<1x8x300xbf16> to vector<8x300xbf16>
    %c0_3 = arith.constant 0 : index
    %c0_4 = arith.constant 0 : index
    %5 = vector.load %arg4[%c0_3, %c0_4] : memref<300x512xbf16, #tpu.memory_space<vmem>>, vector<300x512xbf16>
    %cst = arith.constant dense<0.000000e+00> : vector<8x512xf32>
    %6 = tpu.matmul %4, %5, %cst {dimension_numbers = #tpu.dot_dimension_numbers<[1], [0], [0], [1], [0, 0, 1, 1], [], []>} : vector<8x300xbf16>, vector<300x512xbf16>, vector<8x512xf32> -> vector<8x512xf32>
    %c0_5 = arith.constant 0 : index
    %c0_6 = arith.constant 0 : index
    %7 = vector.load %arg9[%c0_5, %c0_6] : memref<8x128xf32, #tpu.memory_space<vmem>>, vector<8x128xf32>
    %8 = arith.truncf %7 : vector<8x128xf32> to vector<8x128xbf16>
    %c0_7 = arith.constant 0 : index
    %c0_8 = arith.constant 0 : index
    %9 = vector.load %arg5[%c0_7, %c0_8] : memref<128x512xbf16, #tpu.memory_space<vmem>>, vector<128x512xbf16>
    %cst_9 = arith.constant dense<0.000000e+00> : vector<8x512xf32>
    %10 = tpu.matmul %8, %9, %cst_9 {dimension_numbers = #tpu.dot_dimension_numbers<[1], [0], [0], [1], [0, 0, 1, 1], [], []>} : vector<8x128xbf16>, vector<128x512xbf16>, vector<8x512xf32> -> vector<8x512xf32>
    %11 = arith.addf %6, %10 : vector<8x512xf32>
    %c0_10 = arith.constant 0 : index
    %c0_11 = arith.constant 0 : index
    %12 = vector.load %arg6[%c0_10, %c0_11] : memref<1x512xf32, #tpu.memory_space<vmem>>, vector<1x512xf32>
    %13 = vector.broadcast %12 : vector<1x512xf32> to vector<8x512xf32>
    %14 = arith.addf %11, %13 : vector<8x512xf32>
    %15 = vector.extract_strided_slice %14 {offsets = [0, 0], sizes = [8, 384], strides = [1, 1]} : vector<8x512xf32> to vector<8x384xf32>
    %16 = arith.negf %15 : vector<8x384xf32>
    %17 = math.exp %16 : vector<8x384xf32>
    %cst_12 = arith.constant 1.000000e+00 : f32
    %18 = vector.broadcast %cst_12 : f32 to vector<8x384xf32>
    %19 = arith.addf %18, %17 : vector<8x384xf32>
    %20 = arith.divf %18, %19 : vector<8x384xf32>
    %21 = vector.extract_strided_slice %20 {offsets = [0, 0], sizes = [8, 128], strides = [1, 1]} : vector<8x384xf32> to vector<8x128xf32>
    %22 = vector.extract_strided_slice %20 {offsets = [0, 128], sizes = [8, 128], strides = [1, 1]} : vector<8x384xf32> to vector<8x128xf32>
    %23 = vector.extract_strided_slice %20 {offsets = [0, 256], sizes = [8, 128], strides = [1, 1]} : vector<8x384xf32> to vector<8x128xf32>
    %24 = vector.extract_strided_slice %14 {offsets = [0, 384], sizes = [8, 128], strides = [1, 1]} : vector<8x512xf32> to vector<8x128xf32>
    %25 = math.tanh %24 : vector<8x128xf32>
    %c0_13 = arith.constant 0 : index
    %c0_14 = arith.constant 0 : index
    %26 = vector.load %arg10[%c0_13, %c0_14] : memref<8x128xf32, #tpu.memory_space<vmem>>, vector<8x128xf32>
    %27 = arith.mulf %21, %26 : vector<8x128xf32>
    %28 = arith.mulf %22, %25 : vector<8x128xf32>
    %29 = arith.addf %27, %28 : vector<8x128xf32>
    %30 = math.tanh %29 : vector<8x128xf32>
    %31 = arith.mulf %23, %30 : vector<8x128xf32>
    %c0_15 = arith.constant 0 : index
    %c0_16 = arith.constant 0 : index
    %32 = vector.load %arg9[%c0_15, %c0_16] : memref<8x128xf32, #tpu.memory_space<vmem>>, vector<8x128xf32>
    tpu.vector_store %arg9[%c0_15, %c0_16], %31 {strides = array<i32>} : memref<8x128xf32, #tpu.memory_space<vmem>>, vector<8x128xf32>,
    %c0_17 = arith.constant 0 : index
    %c0_18 = arith.constant 0 : index
    %33 = vector.load %arg10[%c0_17, %c0_18] : memref<8x128xf32, #tpu.memory_space<vmem>>, vector<8x128xf32>
    tpu.vector_store %arg10[%c0_17, %c0_18], %29 {strides = array<i32>} : memref<8x128xf32, #tpu.memory_space<vmem>>, vector<8x128xf32>,
    %c0_19 = arith.constant 0 : index
    %c0_20 = arith.constant 0 : index
    %c0_21 = arith.constant 0 : index
    %34 = vector.load %arg7[%c0_19, %c0_20, %c0_21] : memref<1x8x128xf32, #tpu.memory_space<vmem>>, vector<1x8x128xf32>
    %35 = vector.shape_cast %34 : vector<1x8x128xf32> to vector<8x128xf32>
    %36 = vector.shape_cast %31 : vector<8x128xf32> to vector<1x8x128xf32>
    tpu.vector_store %arg7[%c0_19, %c0_20, %c0_21], %36 {strides = array<i32>} : memref<1x8x128xf32, #tpu.memory_space<vmem>>, vector<1x8x128xf32>,
    %c0_22 = arith.constant 0 : index
    %c0_23 = arith.constant 0 : index
    %37 = vector.load %arg8[%c0_22, %c0_23] : memref<8x128xf32, #tpu.memory_space<vmem>>, vector<8x128xf32>
    tpu.vector_store %arg8[%c0_22, %c0_23], %29 {strides = array<i32>} : memref<8x128xf32, #tpu.memory_space<vmem>>, vector<8x128xf32>,
    return
  }
  func.func @transform_0(%arg0: i32) -> (i32, i32, i32) {
    %c0_i32 = arith.constant 0 : i32
    %c0_i32_0 = arith.constant 0 : i32
    %c0_i32_1 = arith.constant 0 : i32
    return %arg0, %c0_i32, %c0_i32_0 : i32, i32, i32
  }
  func.func @transform_1(%arg0: i32) -> (i32, i32) {
    %c0_i32 = arith.constant 0 : i32
    %c0_i32_0 = arith.constant 0 : i32
    %c0_i32_1 = arith.constant 0 : i32
    return %c0_i32, %c0_i32_0 : i32, i32
  }
  func.func @transform_2(%arg0: i32) -> (i32, i32) {
    %c0_i32 = arith.constant 0 : i32
    %c0_i32_0 = arith.constant 0 : i32
    %c0_i32_1 = arith.constant 0 : i32
    return %c0_i32, %c0_i32_0 : i32, i32
  }
  func.func @transform_3(%arg0: i32) -> (i32, i32) {
    %c0_i32 = arith.constant 0 : i32
    %c0_i32_0 = arith.constant 0 : i32
    %c0_i32_1 = arith.constant 0 : i32
    return %c0_i32, %c0_i32_0 : i32, i32
  }
  func.func @transform_4(%arg0: i32) -> (i32, i32) {
    %c0_i32 = arith.constant 0 : i32
    %c0_i32_0 = arith.constant 0 : i32
    %c0_i32_1 = arith.constant 0 : i32
    return %c0_i32, %c0_i32_0 : i32, i32
  }
  func.func @transform_5(%arg0: i32) -> (i32, i32) {
    %c0_i32 = arith.constant 0 : i32
    %c0_i32_0 = arith.constant 0 : i32
    %c0_i32_1 = arith.constant 0 : i32
    return %c0_i32, %c0_i32_0 : i32, i32
  }
  func.func @transform_6(%arg0: i32) -> (i32, i32, i32) {
    %c0_i32 = arith.constant 0 : i32
    %c0_i32_0 = arith.constant 0 : i32
    %c0_i32_1 = arith.constant 0 : i32
    return %arg0, %c0_i32, %c0_i32_0 : i32, i32, i32
  }
  func.func @transform_7(%arg0: i32) -> (i32, i32) {
    %c0_i32 = arith.constant 0 : i32
    %c0_i32_0 = arith.constant 0 : i32
    %c0_i32_1 = arith.constant 0 : i32
    return %c0_i32, %c0_i32_0 : i32, i32
  }
}

</mosaic_0001>

<bundles_post_ra>
// kernel: lstm_sequence.1
= control target key start
LH: loop header
LB: loop body
LE: loop exit
PB: predicated region body
PF: predicated region fallthrough
CT: control target
= control target key end

     0   :  { %s2424_s0 = inlined_call_operand.hbm [shape: bf16[8,8,300], index: 0, kind: input, shape index: {}]   ;;  %s2425_s1 = inlined_call_operand.hbm [shape: f32[8,128], index: 1, kind: input, shape index: {}]   ;;  %s2426_s2 = inlined_call_operand.hbm [shape: f32[8,128], index: 2, kind: input, shape index: {}]   ;;  %s2427_s3 = inlined_call_operand.hbm [shape: bf16[300,512], index: 3, kind: input, shape index: {}]   ;;  %s2428_s4 = inlined_call_operand.hbm [shape: bf16[128,512], index: 4, kind: input, shape index: {}]   ;;  %s2429_s5 = inlined_call_operand.vmem [shape: f32[1,512], index: 5, kind: input, shape index: {}]   ;;  %s2430_s6 = inlined_call_operand.hbm [shape: f32[8,8,128], index: 6, kind: output, shape index: {0}]   ;;  %s2431_s7 = inlined_call_operand.hbm [shape: f32[8,128], index: 7, kind: output, shape index: {1}]  }
   0x1   :  { %2437 = sst [smem:[#allocation21_spill]] %s2425_s1 }
   0x2   :  { %2438 = sst [smem:[#allocation22_spill]] %s2426_s2 }
   0x3   :  { %13 = vsyncpa [#allocation5], 0 }
   0x4   :  { %15 = vsyncpa [#allocation5 + $0x1], 0 }
   0x5   :  { %16 = vsyncpa [#allocation8], 0 }
   0x6   :  { %17 = vsyncpa [#allocation11], 0 }
   0x7   :  { %18 = vsyncpa [#allocation6], 0 }
   0x8   :  { %20 = vsyncpa [#allocation6 + $0x1], 0 }
   0x9   :  { %21 = vsyncpa [#allocation15], 0  ;;  %s2181_s24 = smov 0   ;;  %s2183_s25 = smov 0  }
   0xa   :  { %s2185_s26 = smov 0   ;;  %s2187_s27 = smov 0  }
   0xb LB: > { %s2131_s28 = smov [#allocation7]   ;;  %s2202_s30 = sadd.s32 4294967295, %s2129_s27   ;;  %s2129_s27 = sphi %s2187_s27, %s2463_s27   ;;  %s2125_s26 = sphi %s2185_s26, %s2462_s26   ;;  %s2121_s25 = sphi %s2183_s25, %s2461_s25   ;;  %s2117_s24 = sphi %s2181_s24, %s2460_s24  }
   0xc   : > { %s223_s29 = sshll.u32 %s2131_s28, 4  ;;  %p1478_p0 = scmp.ge.s32.totalorder %s2129_s27, 1  ;;  %s224_s29 = int_to_ptr.vmem [resolvable:$true] %s223_s29 }
   0xd   : > { %p2433_p1 = scmp.eq.s32.totalorder %s2202_s30, 0  ;;  %p210_p2 = scmp.lt.s32.totalorder %s2129_s27, 9 }
   0xe   : > { %s2132_s9 = smov [#allocation10]   ;;  %s2133_s12 = smov [#allocation9]  }
   0xf   : > { %p2208_p4 = pnand %p1478_p0, %p210_p2  ;;  %s244_s10 = sshll.u32 %s2132_s9, 4  ;;  %s2214_s10 = int_to_ptr.vmem [resolvable:$true] %s244_s10 }
  0x10   : > { %s234_s13 = sshll.u32 %s2133_s12, 4  ;;  %s1908_s14 = scalar_lea.vmem %s224_s29, 128  ;;  %s2222_s13 = int_to_ptr.vmem [resolvable:$true] %s234_s13 }
  0x11   : > { %s2439_s8 = scalar_select %p2208_p4, 1, 0 }
  0x12   : > { %p1643_p5 = pneg %p2208_p4  ;;  %p1909_p8 = scmp.ne.s32.totalorder %s224_s29, %s1908_s14 }
  0x13   : > { %p1916_p11 = scmp.lt.s32.totalorder %s224_s29, %s224_s29  ;;  %p1917_p12 = scmp.lt.s32.totalorder %s1908_s14, %s1908_s14 }
  0x14   : > { %p2218_p6 = pnand %p1643_p5, %p2433_p1 }
  0x15   : > { %p1918_p13 = por %p1917_p12, %p1916_p11 }
  0x16   : > { %p1899_p7 = pneg %p2218_p6 }
  0x18   : > { %p1911_p9 = pnand %p1909_p8, %p1899_p7 }
  0x1a   : > { %p1912_p10 = pneg %p1911_p9 }
  0x1c   : > { %p1919_p0 = pnand %p1918_p13, %p1912_p10 }
  0x1e   : > { %1922 = shalt.err (!%p1919_p0)
}
  0x1f   : > { %s2441_s1 = sld [smem:[#allocation21_spill]]  ;;  %s1934_s17 = scalar_lea.vmem %s2214_s10, 9728 }
  0x20   : > { %p1935_p2 = scmp.ne.s32.totalorder %s2214_s10, %s1934_s17  ;;  %p1942_p9 = scmp.lt.s32.totalorder %s2214_s10, %s2214_s10 }
  0x21   : > { %p1943_p10 = scmp.lt.s32.totalorder %s1934_s17, %s1934_s17 }
  0x22   : > { %p1937_p5 = pnand %p1935_p2, %p1899_p7 }
  0x23   : > { %p1944_p11 = por %p1943_p10, %p1942_p9 }
  0x24   : > { %p1938_p8 = pneg %p1937_p5 }
  0x25   : > { %1646 = dma.hbm_to_vmem [thread:$0]  (!%p2218_p6), %s2441_s1, 128, %s224_s29, [#allocation8]  }
  0x26   : > { %p1945_p12 = pnand %p1944_p11, %p1938_p8 }
  0x28   : > { %1948 = shalt.err (!%p1945_p12)
}
  0x29   : > { %s2134_s18 = smov 256   ;;  %s2135_s19 = smov 16  }
  0x2a   : > { %1652 = dma.hbm_to_vmem [thread:$0]  (!%p2218_p6), %s2427_s3, 9728, %s2214_s10, [#allocation11], %s2134_s18, %s2134_s18, %s2135_s19  }
  0x2b   : > { %s1960_s22 = scalar_lea.vmem %s2222_s13, 128  ;;  %p1968_p5 = scmp.lt.s32.totalorder %s2222_s13, %s2222_s13 }
  0x2c   : > { %p1961_p13 = scmp.ne.s32.totalorder %s2222_s13, %s1960_s22  ;;  %p1969_p8 = scmp.lt.s32.totalorder %s1960_s22, %s1960_s22 }
  0x2e   : > { %p1963_p0 = pnand %p1961_p13, %p1899_p7  ;;  %p1970_p9 = por %p1969_p8, %p1968_p5 }
  0x30   : > { %p1964_p2 = pneg %p1963_p0 }
  0x32   : > { %p1971_p10 = pnand %p1970_p9, %p1964_p2 }
  0x34   : > { %1974 = shalt.err (!%p1971_p10)
}
  0x35   : > { %s2442_s2 = sld [smem:[#allocation22_spill]]  ;;  %s2136_s29 = smov [#allocation12]  }
  0x36   : > { %s257_s9 = sshll.u32 %s2136_s29, 4  ;;  %s258_s9 = int_to_ptr.vmem [resolvable:$true] %s257_s9 }
  0x37   : > { %s1986_s10 = scalar_lea.vmem %s258_s9, 4096  ;;  %p1994_p0 = scmp.lt.s32.totalorder %s258_s9, %s258_s9 }
  0x38   : > { %p1987_p11 = scmp.ne.s32.totalorder %s258_s9, %s1986_s10  ;;  %p1995_p2 = scmp.lt.s32.totalorder %s1986_s10, %s1986_s10 }
  0x3a   : > { %p1989_p12 = pnand %p1987_p11, %p1899_p7  ;;  %p1996_p5 = por %p1995_p2, %p1994_p0 }
  0x3b   : > { %1649 = dma.hbm_to_vmem [thread:$0]  (!%p2218_p6), %s2442_s2, 128, %s2222_s13, [#allocation8]  }
  0x3c   : > { %p1990_p13 = pneg %p1989_p12 }
  0x3e   : > { %p1997_p8 = pnand %p1996_p5, %p1990_p13 }
  0x40   : > { %2000 = shalt.err (!%p1997_p8)
}
  0x41   : > { %1655 = dma.hbm_to_vmem [thread:$0]  (!%p2218_p6), %s2428_s4, 4096, %s258_s9, [#allocation11], %s2134_s18, %s2134_s18, %s2135_s19  }
  0x42   : > { %s1477_s11 = sadd.s32 4294967294, %s2129_s27   ;;  %s2270_s13 = sadd.s32 1, %s2129_s27  }
  0x43   : > { %s31_s15 = ssub.s32 %s2129_s27, %s2270_s13  ;;  %s34_s16 = sadd.s32 1, %s2125_s26 }
  0x44   : > { %p32_p7 = scmp.eq.s32.totalorder %s31_s15, 0  ;;  %p41_p9 = scmp.ne.s32.totalorder %s2125_s26, %s2121_s25 }
  0x45   : > { %p42_p10 = scmp.eq.s32.totalorder %s2129_s27, 0  ;;  %p47_p11 = scmp.ne.s32.totalorder %s2121_s25, %s2117_s24 }
  0x46   : > { %s2281_s17 = scalar_select %p32_p7, %s2125_s26, %s34_s16  }
  0x47   : > { %p43_p12 = por %p42_p10, %p41_p9  ;;  %p2285_p13 = por %p2433_p1, %p47_p11 }
  0x48   : > { %p2432_p6 = scmp.eq.s32.totalorder %s2202_s30, 7  ;;  %p182_p0 = scmp.eq.s32.totalorder %s1477_s11, 7 }
  0x49   : > { %s2443_s20 = scalar_select %p2285_p13, 1, 0 }
  0x4a   : > { %p1668_p2 = scmp.lt.s32.totalorder %s2129_s27, 8  ;;  %s274_s18 = sand.u32 1, %s2125_s26  }
  0x4b   : > { %p2294_p5 = por %p2432_p6, %p41_p9  ;;  %p2298_p8 = por %p182_p0, %p47_p11 }
  0x4c   : > { %s1616_s22 = smul.u32 12, %s274_s18  ;;  %p2303_p7 = pnand %p1668_p2, %p43_p12 }
  0x4d   : > { %s2444_s19 = scalar_select %p2294_p5, 1, 0 }
  0x4e   : > { %s2445_s21 = scalar_select %p2298_p8, 1, 0 }
  0x4f   : > { %s1617_s23 = smul.u32 192, %s2129_s27  ;;  %s278_s12 = scalar_lea.vmem [#allocation4], %s1616_s22 }
  0x50   : > { %s286_s14 = sshll.u32 %s278_s12, 4  ;;  %s275_s11 = scalar_lea.sflag [#allocation5], %s274_s18  ;;  %s287_s14 = int_to_ptr.vmem [resolvable:$true] %s286_s14 }
  0x51   : > { %s2310_s10 = scalar_lea.hbm %s2424_s0, %s1617_s23  ;;  %p2003_p10 = pneg %p2303_p7 }
  0x52   : > { %s2001_s15 = scalar_lea.hbm %s2310_s10, 192  ;;  %s2006_s29 = scalar_lea.hbm %s2424_s0, 1536 }
  0x53   : > { %p2002_p9 = scmp.ne.s32.totalorder %s2310_s10, %s2001_s15  ;;  %p2007_p0 = scmp.lt.s32.totalorder %s2310_s10, %s2424_s0 }
  0x54   : > { %p2008_p2 = scmp.lt.s32.totalorder %s2006_s29, %s2001_s15 }
  0x55   : > { %p2004_p11 = pnand %p2003_p10, %p2002_p9 }
  0x56   : > { %p2009_p6 = por %p2008_p2, %p2007_p0 }
  0x57   : > { %p2005_p12 = pneg %p2004_p11 }
  0x59   : > { %p2010_p3 = pnand %p2009_p6, %p2005_p12 }
  0x5b   : > { %2013 = shalt.err (!%p2010_p3)
}
  0x5c   : > { %s2014_s22 = scalar_lea.vmem %s287_s14, 192  ;;  %s2137_s18 = smov [#allocation4]  }
  0x5d   : > { %p2015_p1 = scmp.ne.s32.totalorder %s287_s14, %s2014_s22  ;;  %s2019_s12 = sshll.u32 %s2137_s18, 4  ;;  %s2020_s12 = int_to_ptr.vmem [resolvable:$false] %s2019_s12 }
  0x5e   : > { %s2021_s2 = scalar_lea.vmem %s2020_s12, 384  ;;  %p2022_p9 = scmp.lt.s32.totalorder %s287_s14, %s2020_s12 }
  0x5f   : > { %p2017_p8 = pnand %p2015_p1, %p2003_p10  ;;  %p2023_p11 = scmp.lt.s32.totalorder %s2021_s2, %s2014_s22 }
  0x61   : > { %p2018_p5 = pneg %p2017_p8  ;;  %p2024_p13 = por %p2023_p11, %p2022_p9 }
  0x63   : > { %p2025_p4 = pnand %p2024_p13, %p2018_p5 }
  0x65   : > { %2028 = shalt.err (!%p2025_p4)
}
  0x66   : > { %1659 = dma.hbm_to_vmem [thread:$0]  (!%p2303_p7), %s2310_s10, 192, %s287_s14, %s275_s11  }
  0x67   : > { %p2447_p6 = scmp.ne.s32.totalorder %s2439_s8, 0 }
  0x68   : > { %s2329_s1 = sand.u32 (!%p2447_p6), 1, %s2121_s25   ;;  %p2448_p1 = scmp.ne.s32.totalorder (!%p2447_p6), %s2443_s20, 0 }
  0x69   : > { %295 = sbr.rel (%p2447_p6) target bundleno = 495 (0x1ef), region = 44  ;;  %s298_s16 = scalar_lea.sflag (!%p2447_p6), [#allocation5], %s2329_s1 }
  0x6a   : > { %s1618_s15 = smul.u32 (!%p2447_p6), 12, %s2329_s1 }
  0x6c   : > { %s2333_s29 = scalar_lea.vmem (!%p2447_p6), [#allocation4], %s1618_s15 }
  0x6e   : > { %2096 = dma.done.wait (%p2448_p1), %s298_s16, 192  }
  0x6f   : > { %2098 = vsyncadd (%p2448_p1), %s298_s16, 4294967104  ;;  %p2449_p3 = scmp.eq.s32.totalorder %s2202_s30, 0 }
  0x71   : > { %2100 = dma.done.wait (%p2449_p3), [#allocation8], 256   ;;  %p2450_p4 = pmov %p2449_p3 }
  0x72   : > { %p2451_p13 = pmov %p2449_p3 }
  0x73   : > { %2102 = vsyncadd (%p2450_p4), [#allocation8], 4294967040 }
  0x74   : > { %2104 = dma.done.wait (%p2451_p13), [#allocation11], 13824   ;;  %p2452_p5 = pmov %p2449_p3 }
  0x75   : > { %s1490_s2 = sshll.u32 %s2329_s1, 3  ;;  %p2453_p8 = scmp.ne.s32.totalorder %s2202_s30, 0 }
  0x76   : > { %2106 = vsyncadd (%p2452_p5), [#allocation11], 4294953472  ;;  %s2348_s8 = scalar_lea.vmem [#allocation13], %s1490_s2 }
  0x77   : > { %352 = sbr.rel (%p2453_p8) target bundleno = 126 (0x7e), region = 68 }
  0x7c   : > { %v353_v0 = vld [vmem:[#allocation7] sm:$0xff]  ;;  %v355_v1 = vld [vmem:[#allocation9] sm:$0xff] }
  0x7d   : > { %354 = vst [vmem:[#allocation2] sm:$0xff] %v353_v0  ;;  %356 = vst [vmem:[#allocation3] sm:$0xff] %v355_v1 }
  0x7e PF: > { %v1716_v2 = vld [vmem:[#allocation12 + $0xe4] ss:$16 sps:$4 sm:$0xff]   ;;  %v1718_v3 = vld [vmem:[#allocation12 + $0xec] ss:$16 sps:$4 sm:$0xff]   ;;  %v2138_v4 = vmov 0   ;;  %vm1101_vm0 = vcmask 1045504  }
  0x7f   : > { %661 = vmatprep.mubr.bf16.mxu0 %v2138_v4  ;;  %702 = vmatprep.mubr.bf16.mxu1 %v2138_v4  ;;  %v1720_v5 = vld [vmem:[#allocation12 + $0xe0] ss:$16 sps:$4 sm:$0xff]   ;;  %v1721_v6 = vld [vmem:[#allocation12 + $0xe8] ss:$16 sps:$4 sm:$0xff]   ;;  %v1722_v7 = vld [vmem:[#allocation12 + $0xc4] ss:$16 sps:$4 sm:$0xff]  }
  0x80   : > { %629 = vmatprep.subr.bf16.mxu0 %v1716_v2  ;;  %670 = vmatprep.subr.bf16.mxu1 %v1718_v3  ;;  %v1724_v8 = vld [vmem:[#allocation12 + $0xcc] ss:$16 sps:$4 sm:$0xff]   ;;  %v1726_v9 = vld [vmem:[#allocation12 + $0xc0] ss:$16 sps:$4 sm:$0xff]   ;;  %v1727_v10 = vld [vmem:[#allocation12 + $0xc8] ss:$16 sps:$4 sm:$0xff]  }
  0x81   : > { %630 = vmatpush1.bf16.msra.mxu0 %v1720_v5  ;;  %671 = vmatpush1.bf16.msra.mxu1 %v1721_v6  ;;  %v1728_v11 = vld [vmem:[#allocation12 + $0xa4] ss:$16 sps:$4 sm:$0xff]   ;;  %v1730_v12 = vld [vmem:[#allocation12 + $0xac] ss:$16 sps:$4 sm:$0xff]   ;;  %v1732_v13 = vld [vmem:[#allocation12 + $0xa0] ss:$16 sps:$4 sm:$0xff]  }
  0x82   : > { %631 = vmatprep.subr.bf16.mxu0 %v1722_v7  ;;  %672 = vmatprep.subr.bf16.mxu1 %v1724_v8  ;;  %v1733_v14 = vld [vmem:[#allocation12 + $0xa8] ss:$16 sps:$4 sm:$0xff]   ;;  %v1734_v15 = vld [vmem:[#allocation12 + $0x84] ss:$16 sps:$4 sm:$0xff]   ;;  %v1736_v16 = vld [vmem:[#allocation12 + $0x8c] ss:$16 sps:$4 sm:$0xff]  }
  0x83   : > { %v1738_v17 = vld [vmem:[#allocation12 + $0x80] ss:$16 sps:$4 sm:$0xff]   ;;  %v1739_v18 = vld [vmem:[#allocation12 + $0x88] ss:$16 sps:$4 sm:$0xff]   ;;  %v1740_v19 = vld [vmem:[#allocation12 + $0x64] ss:$16 sps:$4 sm:$0xff]  }
  0x84   : > { %v1742_v20 = vld [vmem:[#allocation12 + $0x6c] ss:$16 sps:$4 sm:$0xff]   ;;  %v1744_v21 = vld [vmem:[#allocation12 + $0x60] ss:$16 sps:$4 sm:$0xff]   ;;  %v1745_v22 = vld [vmem:[#allocation12 + $0x68] ss:$16 sps:$4 sm:$0xff]  }
  0x85   : > { %632 = vmatpush1.bf16.msra.mxu0 %v1726_v9  ;;  %673 = vmatpush1.bf16.msra.mxu1 %v1727_v10  ;;  %v1746_v23 = vld [vmem:[#allocation12 + $0x44] ss:$16 sps:$4 sm:$0xff]   ;;  %v1748_v24 = vld [vmem:[#allocation12 + $0x4c] ss:$16 sps:$4 sm:$0xff]   ;;  %v1750_v25 = vld [vmem:[#allocation12 + $0x40] ss:$16 sps:$4 sm:$0xff]  }
  0x86   : > { %633 = vmatprep.subr.bf16.mxu0 %v1728_v11  ;;  %674 = vmatprep.subr.bf16.mxu1 %v1730_v12  ;;  %v1751_v26 = vld [vmem:[#allocation12 + $0x48] ss:$16 sps:$4 sm:$0xff]   ;;  %v1752_v27 = vld [vmem:[#allocation12 + $0x24] ss:$16 sps:$4 sm:$0xff]   ;;  %v1754_v28 = vld [vmem:[#allocation12 + $0x2c] ss:$16 sps:$4 sm:$0xff]  }
  0x87   : > { %v1756_v29 = vld [vmem:[#allocation12 + $0x20] ss:$16 sps:$4 sm:$0xff]   ;;  %v1757_v30 = vld [vmem:[#allocation12 + $0x28] ss:$16 sps:$4 sm:$0xff]   ;;  %v1758_v31 = vld [vmem:[#allocation12 + $0x4] ss:$16 sps:$4 sm:$0xff]  }
  0x88   : > { %v1760_v32 = vld [vmem:[#allocation12 + $0xc] ss:$16 sps:$4 sm:$0xff]   ;;  %v1762_v33 = vld [vmem:[#allocation12] ss:$16 sps:$4 sm:$0xff]   ;;  %v1763_v34 = vld [vmem:[#allocation12 + $0x8] ss:$16 sps:$4 sm:$0xff]  }
  0x89   : > { %634 = vmatpush1.bf16.msra.mxu0 %v1732_v13  ;;  %675 = vmatpush1.bf16.msra.mxu1 %v1733_v14  ;;  %v435_v35 = vld [vmem:[#allocation2] sm:$0xff]  ;;  %v1767_v36 = vld [vmem:[#allocation10 + $0x244] ss:$16 sps:$4 sm:$0x3f]   ;;  %v1764_v40 = vld [vmem:[#allocation10 + $0xe0] ss:$16 sps:$4 sm:$0xff]  }
  0x8a   : > { %635 = vmatprep.subr.bf16.mxu0 %v1734_v15  ;;  %676 = vmatprep.subr.bf16.mxu1 %v1736_v16  ;;  %v1766_v37 = vld [vmem:[#allocation10 + $0xe4] ss:$16 sps:$4 sm:$0xff]   ;;  %v1769_v38 = vld [vmem:[#allocation10 + $0x240] ss:$16 sps:$4 sm:$0x3f]   ;;  %v436_v39 = vpack.c.bf16 %v435_v35, %v435_v35  ;;  %vm1097_vm1 = vcmask 359424  }
  0x8b   : > { %v1772_v41 = vld [vmem:[#allocation10 + $0xc4] ss:$16 sps:$4 sm:$0xff]   ;;  %v1103_v42 = vsel %vm1101_vm0, %v1769_v38, 0  ;;  %v1770_v44 = vld [vmem:[#allocation10 + $0xc0] ss:$16 sps:$4 sm:$0xff]   ;;  %s2139_s10 = smov [#allocation14]  }
  0x8c   : > { %v1775_v43 = vld [vmem:[#allocation10 + $0x224] ss:$16 sps:$4 sm:$0xff]   ;;  %v1773_v45 = vld [vmem:[#allocation10 + $0x220] ss:$16 sps:$4 sm:$0xff]   ;;  %v1787_v51 = vld [vmem:[#allocation10 + $0xec] ss:$16 sps:$4 sm:$0xff]  }
  0x8d   : > { %636 = vmatpush1.bf16.msra.mxu0 %v1738_v17  ;;  %677 = vmatpush1.bf16.msra.mxu1 %v1739_v18  ;;  %v1778_v46 = vld [vmem:[#allocation10 + $0xa4] ss:$16 sps:$4 sm:$0xff]   ;;  %v1776_v48 = vld [vmem:[#allocation10 + $0xa0] ss:$16 sps:$4 sm:$0xff]   ;;  %v1785_v54 = vld [vmem:[#allocation10 + $0xe8] ss:$16 sps:$4 sm:$0xff]  }
  0x8e   : > { %637 = vmatprep.subr.bf16.mxu0 %v1740_v19  ;;  %678 = vmatprep.subr.bf16.mxu1 %v1742_v20  ;;  %v1781_v47 = vld [vmem:[#allocation10 + $0x204] ss:$16 sps:$4 sm:$0xff]   ;;  %v1779_v49 = vld [vmem:[#allocation10 + $0x200] ss:$16 sps:$4 sm:$0xff]   ;;  %v1794_v56 = vld [vmem:[#allocation10 + $0xcc] ss:$16 sps:$4 sm:$0xff]  }
  0x8f   : > { %v1784_v50 = vld [vmem:[#allocation10 + $0x84] ss:$16 sps:$4 sm:$0xff]   ;;  %v1782_v52 = vld [vmem:[#allocation10 + $0x80] ss:$16 sps:$4 sm:$0xff]   ;;  %v1792_v58 = vld [vmem:[#allocation10 + $0xc8] ss:$16 sps:$4 sm:$0xff]  }
  0x90   : > { %v2358_v53 = vld [vmem:[%s2333_s29 + $0x8] ss:$0 sps:$4 sm:$0xff]   ;;  %v1791_v55 = vld [vmem:[#allocation10 + $0x64] ss:$16 sps:$4 sm:$0xff]   ;;  %v1798_v62 = vld [vmem:[#allocation10 + $0xa8] ss:$16 sps:$4 sm:$0xff]  }
  0x91   : > { %638 = vmatpush1.bf16.msra.mxu0 %v1744_v21  ;;  %679 = vmatpush1.bf16.msra.mxu1 %v1745_v22  ;;  %v1789_v57 = vld [vmem:[#allocation10 + $0x60] ss:$16 sps:$4 sm:$0xff]   ;;  %v1797_v59 = vld [vmem:[#allocation10 + $0x44] ss:$16 sps:$4 sm:$0xff]   ;;  %v1800_v60 = vld [vmem:[#allocation10 + $0xac] ss:$16 sps:$4 sm:$0xff]  }
  0x92   : > { %639 = vmatprep.subr.bf16.mxu0 %v1746_v23  ;;  %680 = vmatprep.subr.bf16.mxu1 %v1748_v24  ;;  %v1795_v61 = vld [vmem:[#allocation10 + $0x40] ss:$16 sps:$4 sm:$0xff]   ;;  %v1803_v63 = vld [vmem:[#allocation10 + $0x24] ss:$16 sps:$4 sm:$0xff]   ;;  %v1806_v0 = vld [vmem:[#allocation10 + $0x8c] ss:$16 sps:$4 sm:$0xff]  }
  0x93   : > { %v1801_v1 = vld [vmem:[#allocation10 + $0x20] ss:$16 sps:$4 sm:$0xff]   ;;  %v1804_v2 = vld [vmem:[#allocation10 + $0x88] ss:$16 sps:$4 sm:$0xff]   ;;  %v1809_v3 = vld [vmem:[#allocation10 + $0x4] ss:$16 sps:$4 sm:$0xff]  }
  0x94   : > { %v1812_v5 = vld [vmem:[#allocation10 + $0x6c] ss:$16 sps:$4 sm:$0xff]   ;;  %v1807_v6 = vld [vmem:[#allocation10] ss:$16 sps:$4 sm:$0xff]   ;;  %v1810_v7 = vld [vmem:[#allocation10 + $0x68] ss:$16 sps:$4 sm:$0xff]  }
  0x95   : > { %640 = vmatpush1.bf16.msra.mxu0 %v1750_v25  ;;  %681 = vmatpush1.bf16.msra.mxu1 %v1751_v26  ;;  %v1815_v8 = vld [vmem:[#allocation10 + $0x1e4] ss:$16 sps:$4 sm:$0xff]   ;;  %v1818_v9 = vld [vmem:[#allocation10 + $0x4c] ss:$16 sps:$4 sm:$0xff]   ;;  %v1813_v10 = vld [vmem:[#allocation10 + $0x1e0] ss:$16 sps:$4 sm:$0xff]  }
  0x96   : > { %641 = vmatprep.subr.bf16.mxu0 %v1752_v27  ;;  %682 = vmatprep.subr.bf16.mxu1 %v1754_v28  ;;  %v1816_v11 = vld [vmem:[#allocation10 + $0x48] ss:$16 sps:$4 sm:$0xff]   ;;  %v1821_v12 = vld [vmem:[#allocation10 + $0x1c4] ss:$16 sps:$4 sm:$0xff]   ;;  %v1824_v13 = vld [vmem:[#allocation10 + $0x2c] ss:$16 sps:$4 sm:$0xff]  }
  0x97   : > { %v357_v14 = vld [vmem:[%s2333_s29] sm:$0xff]  ;;  %v1819_v16 = vld [vmem:[#allocation10 + $0x1c0] ss:$16 sps:$4 sm:$0xff]   ;;  %s1358_s14 = sshll.u32 %s2139_s10, 4  ;;  %p2454_p10 = scmp.eq.s32.totalorder %s2202_s30, 7  ;;  %s1359_s14 = int_to_ptr.vmem [resolvable:$true] %s1358_s14 }
  0x98   : > { %v1525_v15 = vcombine.high %v357_v14, %v357_v14  ;;  %v1822_v17 = vld [vmem:[#allocation10 + $0x28] ss:$16 sps:$4 sm:$0xff]   ;;  %v1827_v18 = vld [vmem:[#allocation10 + $0x1a4] ss:$16 sps:$4 sm:$0xff]   ;;  %v1830_v19 = vld [vmem:[#allocation10 + $0xc] ss:$16 sps:$4 sm:$0xff]   ;;  %p2036_p2 = scmp.lt.s32.totalorder %s1359_s14, %s1359_s14 }
  0x99   : > { %642 = vmatpush1.bf16.msra.mxu0 %v1756_v29  ;;  %683 = vmatpush1.bf16.msra.mxu1 %v1757_v30  ;;  %v1825_v20 = vld [vmem:[#allocation10 + $0x1a0] ss:$16 sps:$4 sm:$0xff]   ;;  %v1828_v21 = vld [vmem:[#allocation10 + $0x8] ss:$16 sps:$4 sm:$0xff]   ;;  %v1833_v22 = vld [vmem:[#allocation10 + $0x184] ss:$16 sps:$4 sm:$0xff]  }
  0x9a   : > { %643 = vmatprep.subr.bf16.mxu0 %v1758_v31  ;;  %684 = vmatprep.subr.bf16.mxu1 %v1760_v32  ;;  %v1836_v23 = vld [vmem:[#allocation10 + $0x1ec] ss:$16 sps:$4 sm:$0xff]   ;;  %v1831_v24 = vld [vmem:[#allocation10 + $0x180] ss:$16 sps:$4 sm:$0xff]   ;;  %v1834_v25 = vld [vmem:[#allocation10 + $0x1e8] ss:$16 sps:$4 sm:$0xff]  }
  0x9b   : > { %v1839_v26 = vld [vmem:[#allocation10 + $0x164] ss:$16 sps:$4 sm:$0xff]   ;;  %v1842_v27 = vld [vmem:[#allocation10 + $0x1cc] ss:$16 sps:$4 sm:$0xff]   ;;  %v1837_v28 = vld [vmem:[#allocation10 + $0x160] ss:$16 sps:$4 sm:$0xff]  }
  0x9c   : > { %v1840_v29 = vld [vmem:[#allocation10 + $0x1c8] ss:$16 sps:$4 sm:$0xff]   ;;  %v1845_v30 = vld [vmem:[#allocation10 + $0x144] ss:$16 sps:$4 sm:$0xff]   ;;  %v1848_v31 = vld [vmem:[#allocation10 + $0x1ac] ss:$16 sps:$4 sm:$0xff]  }
  0x9d   : > { %644 = vmatpush1.bf16.msra.mxu0 %v1762_v33  ;;  %685 = vmatpush1.bf16.msra.mxu1 %v1763_v34  ;;  %v1843_v32 = vld [vmem:[#allocation10 + $0x140] ss:$16 sps:$4 sm:$0xff]   ;;  %v1846_v33 = vld [vmem:[#allocation10 + $0x1a8] ss:$16 sps:$4 sm:$0xff]   ;;  %v1851_v34 = vld [vmem:[#allocation10 + $0x124] ss:$16 sps:$4 sm:$0xff]  }
  0x9e   : > { %1114 = vmatprep.subr.bf16.mxu0 %v1766_v37  ;;  %1603 = vmatprep.subr.msk.bf16.mxu1 %vm1101_vm0, %v1767_v36  ;;  %v1854_v35 = vld [vmem:[#allocation10 + $0x18c] ss:$16 sps:$4 sm:$0xff]   ;;  %v1849_v36 = vld [vmem:[#allocation10 + $0x120] ss:$16 sps:$4 sm:$0xff]   ;;  %v1852_v37 = vld [vmem:[#allocation10 + $0x188] ss:$16 sps:$4 sm:$0xff]  }
  0x9f   : > { %v1857_v38 = vld [vmem:[#allocation10 + $0x104] ss:$16 sps:$4 sm:$0xff]   ;;  %s2029_s11 = scalar_lea.vmem %s1359_s14, 128 }
  0xa0   : > { %662 = vmatmul.mubr.bf16.vlgmr.msra.gmra.mxu0 %v436_v39  ;;  %703 = vmatmul.mubr.bf16.vlgmr.msra.gmra.mxu1 %v436_v39  ;;  %v1860_v39 = vld [vmem:[#allocation10 + $0x16c] ss:$16 sps:$4 sm:$0xff]   ;;  %p2030_p7 = scmp.ne.s32.totalorder %s1359_s14, %s2029_s11  ;;  %p2037_p9 = scmp.lt.s32.totalorder %s2029_s11, %s2029_s11 }
  0xa1   : > { %1115 = vmatpush1.bf16.msra.mxu0 %v1764_v40  ;;  %1166 = vmatpush1.bf16.msra.mxu1 %v1103_v42  ;;  %v1855_v40 = vld [vmem:[#allocation10 + $0x100] ss:$16 sps:$4 sm:$0xff]   ;;  %v1865_v42 = vld [vmem:[#allocation10 + $0x14c] ss:$16 sps:$4 sm:$0xff]  }
  0xa2   : > { %1116 = vmatprep.subr.bf16.mxu0 %v1772_v41  ;;  %1167 = vmatprep.subr.bf16.mxu1 %v1775_v43  ;;  %v1858_v41 = vld [vmem:[#allocation10 + $0x168] ss:$16 sps:$4 sm:$0xff]   ;;  %v1866_v43 = vld [vmem:[#allocation10 + $0x24c] ss:$16 sps:$4 sm:$0x3f]   ;;  %p2031_p12 = pnand %p2030_p7, %p2454_p10  ;;  %p2038_p11 = por %p2037_p9, %p2036_p2 }
  0xa3   : > { %1187 = vmatprep.mubr.bf16.mxu1 %v2138_v4  ;;  %1146 = vmatprep.mubr.bf16.mxu0 %v1525_v15 }
  0xa4   : > { %p2032_p0 = pneg %p2031_p12 }
  0xa5   : > { %1117 = vmatpush1.bf16.msra.mxu0 %v1770_v44  ;;  %1168 = vmatpush1.bf16.msra.mxu1 %v1773_v45  ;;  %v1868_v44 = vld [vmem:[#allocation10 + $0x248] ss:$16 sps:$4 sm:$0x3f]   ;;  %v1524_v45 = vcombine.low %v357_v14, %v357_v14 }
  0xa6   : > { %1118 = vmatprep.subr.bf16.mxu0 %v1778_v46  ;;  %1169 = vmatprep.subr.bf16.mxu1 %v1781_v47  ;;  %v1863_v46 = vld [vmem:[#allocation10 + $0x148] ss:$16 sps:$4 sm:$0xff]   ;;  %v1109_v47 = vsel %vm1101_vm0, %v1868_v44, 0  ;;  %p2039_p6 = pnand %p2038_p11, %p2032_p0 }
  0xa9   : > { %1119 = vmatpush1.bf16.msra.mxu0 %v1776_v48  ;;  %1170 = vmatpush1.bf16.msra.mxu1 %v1779_v49  ;;  %v1871_v48 = vld [vmem:[#allocation10 + $0x12c] ss:$16 sps:$4 sm:$0xff]  }
  0xaa   : > { %1120 = vmatprep.subr.bf16.mxu0 %v1784_v50  ;;  %1196 = vmatprep.subr.bf16.mxu1 %v1787_v51  ;;  %v1874_v49 = vld [vmem:[#allocation10 + $0x22c] ss:$16 sps:$4 sm:$0xff]   ;;  %v1869_v50 = vld [vmem:[#allocation10 + $0x128] ss:$16 sps:$4 sm:$0xff]  }
  0xab   : > { %v1872_v51 = vld [vmem:[#allocation10 + $0x228] ss:$16 sps:$4 sm:$0xff]  }
  0xac   : > { %1604 = vmatmul.mubr.msk.bf16.vlgmr.msra.gmra.mxu1 %vm1097_vm1, %v2358_v53 }
  0xad   : > { %1121 = vmatpush1.bf16.msra.mxu0 %v1782_v52  ;;  %1197 = vmatpush1.bf16.msra.mxu1 %v1785_v54  ;;  %v1877_v52 = vld [vmem:[#allocation10 + $0x10c] ss:$16 sps:$4 sm:$0xff]  }
  0xae   : > { %1122 = vmatprep.subr.bf16.mxu0 %v1791_v55  ;;  %1198 = vmatprep.subr.bf16.mxu1 %v1794_v56  ;;  %v1880_v54 = vld [vmem:[#allocation10 + $0x20c] ss:$16 sps:$4 sm:$0xff]   ;;  %v1875_v55 = vld [vmem:[#allocation10 + $0x108] ss:$16 sps:$4 sm:$0xff]  }
  0xaf   : > { %1228 = vmatprep.mubr.bf16.mxu1 %v1525_v15  ;;  %v1878_v56 = vld [vmem:[#allocation10 + $0x208] ss:$16 sps:$4 sm:$0xff]  }
  0xb1   : > { %1123 = vmatpush1.bf16.msra.mxu0 %v1789_v57  ;;  %1199 = vmatpush1.bf16.msra.mxu1 %v1792_v58 }
  0xb2   : > { %1124 = vmatprep.subr.bf16.mxu0 %v1797_v59  ;;  %1200 = vmatprep.subr.bf16.mxu1 %v1800_v60 }
  0xb5   : > { %1125 = vmatpush1.bf16.msra.mxu0 %v1795_v61  ;;  %1201 = vmatpush1.bf16.msra.mxu1 %v1798_v62 }
  0xb6   : > { %1126 = vmatprep.subr.bf16.mxu0 %v1803_v63  ;;  %1202 = vmatprep.subr.bf16.mxu1 %v1806_v0 }
  0xb9   : > { %1127 = vmatpush1.bf16.msra.mxu0 %v1801_v1  ;;  %1203 = vmatpush1.bf16.msra.mxu1 %v1804_v2 }
  0xba   : > { %1128 = vmatprep.subr.bf16.mxu0 %v1809_v3  ;;  %1204 = vmatprep.subr.bf16.mxu1 %v1812_v5  ;;  %v1280_v5 = vlaneseq }
  0xbd   : > { %1129 = vmatpush1.bf16.msra.mxu0 %v1807_v6  ;;  %1205 = vmatpush1.bf16.msra.mxu1 %v1810_v7  ;;  %v1281_v6 = vshrl.u32 %v1280_v5, 7 }
  0xbe   : > { %1130 = vmatprep.subr.bf16.mxu0 %v1815_v8  ;;  %1206 = vmatprep.subr.bf16.mxu1 %v1818_v9  ;;  %v1278_v8 = vld [vmem:[%s2429_s5] sm:$0xf] }
  0xbf   : > { %v1282_v7 = vsub.s32 0, %v1281_v6 }
  0xc1   : > { %1131 = vmatpush2.bf16.msra.mxu0 %v1813_v10  ;;  %1207 = vmatpush1.bf16.msra.mxu1 %v1816_v11  ;;  %v1283_v11 = vrot.slane %v1278_v8, %v1282_v7 }
  0xc2   : > { %1132 = vmatprep.subr.bf16.mxu0 %v1821_v12  ;;  %1208 = vmatprep.subr.bf16.mxu1 %v1824_v13 }
  0xc5   : > { %1133 = vmatpush2.bf16.msra.mxu0 %v1819_v16  ;;  %1209 = vmatpush1.bf16.msra.mxu1 %v1822_v17 }
  0xc6   : > { %1134 = vmatprep.subr.bf16.mxu0 %v1827_v18  ;;  %1210 = vmatprep.subr.bf16.mxu1 %v1830_v19 }
  0xc9   : > { %1135 = vmatpush2.bf16.msra.mxu0 %v1825_v20  ;;  %1211 = vmatpush1.bf16.msra.mxu1 %v1828_v21 }
  0xca   : > { %1136 = vmatprep.subr.bf16.mxu0 %v1833_v22  ;;  %1212 = vmatprep.subr.bf16.mxu1 %v1836_v23  ;;  %v1290_v23 = vsub.s32 2, %v1281_v6 }
  0xcd   : > { %1137 = vmatpush2.bf16.msra.mxu0 %v1831_v24  ;;  %1213 = vmatpush2.bf16.msra.mxu1 %v1834_v25 }
  0xce   : > { %1138 = vmatprep.subr.bf16.mxu0 %v1839_v26  ;;  %1214 = vmatprep.subr.bf16.mxu1 %v1842_v27  ;;  %v1291_v27 = vrot.slane %v1278_v8, %v1290_v23 }
  0xd1   : > { %1139 = vmatpush2.bf16.msra.mxu0 %v1837_v28  ;;  %1215 = vmatpush2.bf16.msra.mxu1 %v1840_v29 }
  0xd2   : > { %1140 = vmatprep.subr.bf16.mxu0 %v1845_v30  ;;  %1216 = vmatprep.subr.bf16.mxu1 %v1848_v31  ;;  %v1294_v30 = vsub.s32 3, %v1281_v6 }
  0xd5   : > { %1141 = vmatpush2.bf16.msra.mxu0 %v1843_v32  ;;  %1217 = vmatpush2.bf16.msra.mxu1 %v1846_v33 }
  0xd6   : > { %1142 = vmatprep.subr.bf16.mxu0 %v1851_v34  ;;  %1218 = vmatprep.subr.bf16.mxu1 %v1854_v35 }
  0xd9   : > { %1143 = vmatpush2.bf16.msra.mxu0 %v1849_v36  ;;  %1219 = vmatpush2.bf16.msra.mxu1 %v1852_v37  ;;  %v1295_v37 = vrot.slane %v1278_v8, %v1294_v30 }
  0xda   : > { %1144 = vmatprep.subr.bf16.mxu0 %v1857_v38  ;;  %1220 = vmatprep.subr.bf16.mxu1 %v1860_v39 }
  0xdd   : > { %1145 = vmatpush2.bf16.msra.mxu0 %v1855_v40  ;;  %1221 = vmatpush2.bf16.msra.mxu1 %v1858_v41 }
  0xde   : > { %1222 = vmatprep.subr.bf16.mxu1 %v1865_v42  ;;  %1605 = vmatprep.subr.msk.bf16.mxu0 %vm1101_vm0, %v1866_v43 }
  0xe0   : > { %1147 = vmatmul.mubr.bf16.vlgmr.msra.gmra.mxu0 %v1524_v45 }
  0xe1   : > { %1223 = vmatpush2.bf16.msra.mxu1 %v1863_v46  ;;  %1248 = vmatpush1.bf16.msra.mxu0 %v1109_v47 }
  0xe2   : > { %1224 = vmatprep.subr.bf16.mxu1 %v1871_v48  ;;  %1249 = vmatprep.subr.bf16.mxu0 %v1874_v49  ;;  %v1323_v48 = vld [vmem:[#allocation3] sm:$0xff] }
  0xe3   : > { %1269 = vmatprep.mubr.bf16.mxu0 %v2138_v4 }
  0xe5   : > { %1225 = vmatpush2.bf16.msra.mxu1 %v1869_v50  ;;  %1250 = vmatpush1.bf16.msra.mxu0 %v1872_v51 }
  0xe6   : > { %1226 = vmatprep.subr.bf16.mxu1 %v1877_v52  ;;  %1251 = vmatprep.subr.bf16.mxu0 %v1880_v54 }
  0xe9   : > { %1227 = vmatpush2.bf16.msra.mxu1 %v1875_v55  ;;  %1252 = vmatpush1.bf16.msra.mxu0 %v1878_v56 }
  0xec   : > { %1229 = vmatmul.mubr.bf16.vlgmr.msra.gmra.mxu1 %v1524_v45  ;;  %1606 = vmatmul.mubr.msk.bf16.vlgmr.msra.gmra.mxu0 %vm1097_vm1, %v2358_v53  ;;  %v1286_v53 = vsub.s32 1, %v1281_v6 }
  0xee   : > { %v1287_v15 = vrot.slane %v1278_v8, %v1286_v53 }
 0x160   : > { %v663_v57 = vpop.f32.mrf.mxu0  ;;  %v704_v58 = vpop.f32.mrf.mxu1 }
 0x162   : > { %v665_v59 = vpop.f32.mrf.mxu0  ;;  %v706_v60 = vpop.f32.mrf.mxu1 }
 0x164   : > { %v667_v61 = vpop.f32.mrf.mxu0  ;;  %v708_v62 = vpop.f32.mrf.mxu1 }
 0x166   : > { %v668_v63 = vpop.f32.mrf.mxu0  ;;  %v709_v4 = vpop.f32.mrf.mxu1 }
 0x16c   : > { %v1189_v0 = vpop.f32.mrf.mxu1 }
 0x16e   : > { %v1191_v1 = vpop.f32.mrf.mxu1 }
 0x170   : > { %v1193_v2 = vpop.f32.mrf.mxu1 }
 0x172   : > { %v1194_v3 = vpop.f32.mrf.mxu1 }
 0x1a0   : > { %v1148_v9 = vpop.f32.mrf.mxu0 }
 0x1a1   : > { %v1149_v10 = vadd.f32 %v1148_v9, %v663_v57 }
 0x1a2   : > { %v1150_v12 = vpop.f32.mrf.mxu0 }
 0x1a3   : > { %v1190_v13 = vadd.f32 %v1189_v0, %v1149_v10  ;;  %v1151_v14 = vadd.f32 %v1150_v12, %v665_v59 }
 0x1a4   : > { %v1152_v16 = vpop.f32.mrf.mxu0 }
 0x1a5   : > { %v1300_v17 = vadd.f32 %v1283_v11, %v1190_v13  ;;  %v1192_v18 = vadd.f32 %v1191_v1, %v1151_v14 }
 0x1a6   : > { %v1153_v19 = vpop.f32.mrf.mxu0 }
 0x1a7   : > { %v1607_v20 = vmul.f32 -1.442695, %v1300_v17  ;;  %v1301_v21 = vadd.f32 %v1287_v15, %v1192_v18 }
 0x1a9   : > { %1881 = vpow2.f32 %v1607_v20  ;;  %v1608_v22 = vmul.f32 -1.442695, %v1301_v21 }
 0x1ab   : > { %1883 = vpow2.f32 %v1608_v22 }
 0x1ac   : > { %v1230_v24 = vpop.f32.mrf.mxu1  ;;  %v1271_v25 = vpop.f32.mrf.mxu0 }
 0x1ad   : > { %v1231_v26 = vadd.f32 %v1230_v24, %v704_v58 }
 0x1ae   : > { %v1232_v28 = vpop.f32.mrf.mxu1  ;;  %v1273_v29 = vpop.f32.mrf.mxu0 }
 0x1af   : > { %v1233_v31 = vadd.f32 %v1232_v28, %v706_v60  ;;  %v1272_v32 = vadd.f32 %v1271_v25, %v1231_v26 }
 0x1b0   : > { %v1234_v33 = vpop.f32.mrf.mxu1  ;;  %v1275_v34 = vpop.f32.mrf.mxu0 }
 0x1b1   : > { %v1302_v35 = vadd.f32 %v1291_v27, %v1272_v32  ;;  %v1274_v36 = vadd.f32 %v1273_v29, %v1233_v31 }
 0x1b2   : > { %v1235_v38 = vpop.f32.mrf.mxu1  ;;  %v1276_v39 = vpop.f32.mrf.mxu0 }
 0x1b3   : > { %v1609_v40 = vmul.f32 -1.442695, %v1302_v35  ;;  %v1303_v42 = vadd.f32 %v1295_v37, %v1274_v36 }
 0x1b5   : > { %1885 = vpow2.f32 %v1609_v40 }
 0x1b6   : > { %v1882_v41 = vpop.eup %1881 }
 0x1b7   : > { %v1313_v43 = vadd.f32 1.0, %v1882_v41 }
 0x1b8   : > { %v1884_v44 = vpop.eup %1883 }
 0x1b9   : > { %1887 = vrcp.f32 %v1313_v43  ;;  %v1314_v45 = vadd.f32 1.0, %v1884_v44 }
 0x1ba   : > { %1889 = vtanh.f32 %v1303_v42 }
 0x1bb   : > { %1891 = vrcp.f32 %v1314_v45 }
 0x1c2   : > { %v1886_v46 = vpop.eup %1885 }
 0x1c3   : > { %v1315_v51 = vadd.f32 1.0, %v1886_v46 }
 0x1c5   : > { %1893 = vrcp.f32 %v1315_v51 }
 0x1c6   : > { %v1888_v47 = vpop.eup %1887 }
 0x1c7   : > { %v1890_v49 = vpop.eup %1889  ;;  %v1324_v52 = vmul.f32 %v1888_v47, %v1323_v48 }
 0x1c8   : > { %v1892_v50 = vpop.eup %1891 }
 0x1c9   : > { %v1325_v54 = vmul.f32 %v1892_v50, %v1890_v49 }
 0x1cb   : > { %v1326_v55 = vadd.f32 %v1325_v54, %v1324_v52 }
 0x1cd   : > { %1330 = vst [vmem:[#allocation3] sm:$0xff] %v1326_v55  ;;  %1332 = vst [vmem:[#allocation14] sm:$0xff] %v1326_v55  ;;  %1895 = vtanh.f32 %v1326_v55 }
 0x1ce   : > { %2042 = shalt.err (!%p2039_p6)
}
 0x1cf   : > { %p2455_p1 = pmov %p2454_p10  ;;  %s1611_s22 = sshll.u32 %s2202_s30, 7 }
 0x1d0   : > { %s1347_s18 = sshll.u32 %s2348_s8, 4  ;;  %s2383_s16 = scalar_lea.hbm %s2430_s6, %s1611_s22  ;;  %s1348_s18 = int_to_ptr.vmem [resolvable:$true] %s1347_s18 }
 0x1d1   : > { %1639 = dma.vmem_to_hbm [thread:$0]  (%p2455_p1), %s1359_s14, 128, %s2431_s7, [#allocation15]  }
 0x1d2   : > { %v1894_v56 = vpop.eup %1893  ;;  %s1334_s29 = scalar_lea.sflag [#allocation6], %s2329_s1  ;;  %s2053_s2 = scalar_lea.vmem %s1348_s18, 128 }
 0x1d3   : > { %p2054_p3 = scmp.ne.s32.totalorder %s1348_s18, %s2053_s2  ;;  %p2456_p4 = scmp.ne.s32.totalorder %s2444_s19, 0 }
 0x1d4   : > { %s2140_s20 = smov [#allocation13]  }
 0x1d5   : > { %p2055_p13 = pnand %p2054_p3, %p2456_p4  ;;  %s2057_s28 = sshll.u32 %s2140_s20, 4  ;;  %s2058_s28 = int_to_ptr.vmem [resolvable:$false] %s2057_s28 }
 0x1d6   : > { %s2059_s10 = scalar_lea.vmem %s2058_s28, 256  ;;  %p2060_p8 = scmp.lt.s32.totalorder %s1348_s18, %s2058_s28 }
 0x1d7   : > { %p2056_p5 = pneg %p2055_p13  ;;  %p2061_p7 = scmp.lt.s32.totalorder %s2059_s10, %s2053_s2 }
 0x1d9   : > { %p2062_p10 = por %p2061_p7, %p2060_p8 }
 0x1da   : > { %v1896_v57 = vpop.eup %1895 }
 0x1db   : > { %v1328_v58 = vmul.f32 %v1896_v57, %v1894_v56  ;;  %p2063_p12 = pnand %p2062_p10, %p2056_p5 }
 0x1dd   : > { %1329 = vst [vmem:[#allocation2] sm:$0xff] %v1328_v58  ;;  %1331 = vst [vmem:[%s2348_s8] sm:$0xff] %v1328_v58 }
 0x1de   : > { %2066 = shalt.err (!%p2063_p12)
}
 0x1df   : > { %s2067_s8 = scalar_lea.hbm %s2383_s16, 128  ;;  %s2071_s11 = scalar_lea.hbm %s2430_s6, 1024 }
 0x1e0   : > { %p2068_p0 = scmp.ne.s32.totalorder %s2383_s16, %s2067_s8  ;;  %p2072_p11 = scmp.lt.s32.totalorder %s2383_s16, %s2430_s6 }
 0x1e1   : > { %p2073_p6 = scmp.lt.s32.totalorder %s2071_s11, %s2067_s8 }
 0x1e2   : > { %p2069_p2 = pnand %p2068_p0, %p2456_p4 }
 0x1e3   : > { %p2074_p1 = por %p2073_p6, %p2072_p11 }
 0x1e4   : > { %p2070_p9 = pneg %p2069_p2 }
 0x1e6   : > { %p2075_p3 = pnand %p2074_p1, %p2070_p9 }
 0x1e8   : > { %2078 = shalt.err (!%p2075_p3)
}
 0x1e9   : > { %1637 = dma.vmem_to_hbm [thread:$0]  (%p2456_p4), %s1348_s18, 128, %s2383_s16, %s1334_s29  }
 0x1ea   : > { %p2457_p13 = scmp.eq.s32.totalorder %s2202_s30, 7 }
 0x1ec   : > { %2108 = dma.done.wait (%p2457_p13), [#allocation15], 128   ;;  %p2458_p5 = pmov %p2457_p13 }
 0x1ee   : > { %2110 = vsyncadd (%p2458_p5), [#allocation15], 4294967168 }
 0x1ef PF: > { %p1675_p8 = scmp.ge.s32.totalorder %s2129_s27, 2  ;;  %s1374_s22 = sand.u32 1, %s2117_s24  }
 0x1f0   : > { %p2459_p7 = scmp.ne.s32.totalorder %s2445_s21, 0  ;;  %s1375_s12 = scalar_lea.sflag [#allocation6], %s1374_s22 }
 0x1f2   : > { %p1661_p10 = pnand %p1675_p8, %p2459_p7 }
 0x1f4   : > { %p1662_p12 = pneg %p1661_p10 }
 0x1f6   : > { %2112 = dma.done.wait (%p1662_p12), %s1375_s12, 128  }
 0x1f7   : > { %2114 = vsyncadd (%p1662_p12), %s1375_s12, 4294967168  ;;  %p24_p4 = scmp.ge.s32.totalorder %s2270_s13, 10   ;;  %s2460_s24 = smov %s2121_s25 }
 0x1f8   : > { %s2461_s25 = smov %s2125_s26  ;;  %s2462_s26 = smov %s2281_s17 }
 0x1f9   : > { %s2463_s27 = smov %s2270_s13  ;;  %26 = sbr.rel (!%p24_p4) target bundleno = 11 (0xb), region = 117 }
 0x1fe   :  { %1380 = vsyncpa [#allocation5], 1 }
 0x1ff   :  { %1382 = vsyncpa [#allocation5 + $0x1], 1 }
 0x200   :  { %1383 = vsyncpa [#allocation8], 1 }
 0x201   :  { %1384 = vsyncpa [#allocation11], 1 }
 0x202   :  { %1385 = vsyncpa [#allocation6], 1 }
 0x203   :  { %1387 = vsyncpa [#allocation6 + $0x1], 1 }
 0x204   :  { %1388 = vsyncpa [#allocation15], 1 }

</bundles_post_ra>
